<compile_context>
chip_gen: v5e
topology: v5e:2x2
jax: 0.10.0
libtpu: 0.0.40
codegen_flags: <defaults>
</compile_context>

<pallas_src>
import functools

import jax
import jax.numpy as jnp
from jax.experimental import pallas as pl
from jax.experimental.pallas import tpu as pltpu


def _round_up(x, m):
    return (x + m - 1) // m * m


# 48 MiB: well above the 16/32 MiB scoped defaults, still under v7x's 64 MiB.
_VMEM_LIMIT = 48 * 1024 * 1024


# ------------------ fused linear (resident weight, no K loop) ----------------

def _fused_linear_kernel(x_ref, w_ref, b_ref, *rest,
                         activation, has_ln, has_res, ln_eps):
    idx = 0
    if has_ln:
        g_ref, beta_ref = rest[0], rest[1]
        idx = 2
    if has_res:
        res_ref = rest[idx]
        idx += 1
    o_ref = rest[idx]

    x = x_ref[...]
    if has_ln:
        # LayerNorm prologue (K untiled, runs once per x tile).
        xf = x.astype(jnp.float32)
        mu = jnp.mean(xf, axis=-1, keepdims=True)
        xc = xf - mu
        var = jnp.mean(xc * xc, axis=-1, keepdims=True)
        inv = jax.lax.rsqrt(var + ln_eps)
        xf = xc * inv * g_ref[...] + beta_ref[...]
        x = xf.astype(jnp.bfloat16)
    else:
        x = x.astype(jnp.bfloat16)

    r = jnp.dot(x, w_ref[...], preferred_element_type=jnp.float32)
    r = r + b_ref[...].astype(jnp.float32)
    if activation == "gelu":
        # TODO(synk): tanh-approx GELU (timm/TransReID use erf GELU).
        r = 0.5 * r * (1.0 + jnp.tanh(
            0.7978845608028654 * (r + 0.044715 * r * r * r)))
    if has_res:
        r = r + res_ref[...].astype(jnp.float32)
    o_ref[...] = r.astype(o_ref.dtype)


def fused_linear(x, w, b, *, ln=None, activation=None, residual=None,
                 out_dtype=jnp.bfloat16, ln_eps=1e-6, tm=512):
    """y = act(LN(x) @ W + b) (+ residual).

    bf16 MXU matmul with f32 accumulation.  W (and bias / LN params) are
    VMEM-resident: index_map returns (0, 0) for every M tile so they are
    streamed from HBM exactly once.  Grid is ragged over M (pl.cdiv), no
    activation padding / slicing ever happens in XLA.
    """
    M, K = x.shape
    N = w.shape[1]
    tm = min(tm, _round_up(M, 8))
    grid_m = pl.cdiv(M, tm)

    in_arrays = [x, w.astype(jnp.bfloat16), b.reshape(1, N).astype(jnp.float32)]
    in_specs = [pl.BlockSpec((tm, K), lambda i: (i, 0)),
                pl.BlockSpec((K, N), lambda i: (0, 0)),      # resident weight
                pl.BlockSpec((1, N), lambda i: (0, 0))]

    has_ln = ln is not None
    if has_ln:
        g, be = ln
        in_arrays += [g.reshape(1, K).astype(jnp.float32),
                      be.reshape(1, K).astype(jnp.float32)]
        in_specs += [pl.BlockSpec((1, K), lambda i: (0, 0)),
                     pl.BlockSpec((1, K), lambda i: (0, 0))]

    has_res = residual is not None
    if has_res:
        in_arrays.append(residual)
        in_specs.append(pl.BlockSpec((tm, N), lambda i: (i, 0)))

    kern = functools.partial(_fused_linear_kernel, activation=activation,
                             has_ln=has_ln, has_res=has_res, ln_eps=ln_eps)
    return pl.pallas_call(
        kern,
        out_shape=jax.ShapeDtypeStruct((M, N), out_dtype),
        grid=(grid_m,),
        in_specs=in_specs,
        out_specs=pl.BlockSpec((tm, N), lambda i: (i, 0)),
        compiler_params=pltpu.CompilerParams(
            dimension_semantics=("parallel",),
            vmem_limit_bytes=_VMEM_LIMIT),
    )(*in_arrays)


# ------------------------------ attention kernel ----------------------------

def _head_group_lanes(D, num_heads):
    """Lane width of one head group: >= 128 lanes if possible (2 heads of 64
    on ViT-B), otherwise the full embedding width."""
    hd = D // num_heads
    lanes = hd
    while lanes < 128 and 2 * lanes <= D and D % (2 * lanes) == 0:
        lanes *= 2
    if lanes % 128 != 0 and lanes != D:
        lanes = D
    if D % lanes != 0:
        lanes = D
    return lanes


def prep_qkv_params(qkv_w, qkv_b, D, num_heads):
    """Fold the softmax scale into the q columns and permute the QKV output
    columns into head-group-major [q_g | k_g | v_g] layout so attention loads
    and stores are 128-lane aligned.  Done once at parameter-prep time."""
    hd = D // num_heads
    lanes = _head_group_lanes(D, num_heads)
    G = D // lanes
    scale = hd ** -0.5
    w = qkv_w.astype(jnp.float32)
    b = qkv_b.astype(jnp.float32)
    w = w.at[:, :D].multiply(scale)
    b = b.at[:D].multiply(scale)
    perm = []
    for g in range(G):
        for part in range(3):                         # q, k, v of this group
            start = part * D + g * lanes
            perm.extend(range(start, start + lanes))
    perm = jnp.asarray(perm, dtype=jnp.int32)
    return w[:, perm].astype(jnp.bfloat16), b[perm]


def _attn_kernel(qkv_ref, o_ref, *, heads_per_group, head_dim):
    lanes = heads_per_group * head_dim
    blk = qkv_ref[0]                                   # (S, 3*lanes) = [q|k|v]
    outs = []
    for h in range(heads_per_group):
        q = blk[:, h * head_dim:(h + 1) * head_dim]
        k = blk[:, lanes + h * head_dim:lanes + (h + 1) * head_dim]
        v = blk[:, 2 * lanes + h * head_dim:2 * lanes + (h + 1) * head_dim]
        # scale already folded into q at param-prep time
        s = jax.lax.dot_general(q, k, (((1,), (1,)), ((), ())),
                                preferred_element_type=jnp.float32)
        m = jnp.max(s, axis=-1, keepdims=True)
        p = jnp.exp(s - m)
        denom = jnp.sum(p, axis=-1, keepdims=True)
        p = p * pl.reciprocal(denom, approx=True)
        outs.append(jnp.dot(p.astype(v.dtype), v,
                            preferred_element_type=jnp.float32))
    out = outs[0] if len(outs) == 1 else jnp.concatenate(outs, axis=-1)
    o_ref[0] = out.astype(o_ref.dtype)                 # 128-lane-dense store


def pallas_attention(qkv_grouped, D, num_heads, out_dtype=jnp.bfloat16):
    """qkv_grouped: (B, S, 3*D) slab in head-group-major layout
    [q_g0|k_g0|v_g0 | q_g1|k_g1|v_g1 | ...].  Returns (B, S, D) with heads in
    natural order (so the proj weight is unchanged)."""
    B, S, _ = qkv_grouped.shape
    hd = D // num_heads
    lanes = _head_group_lanes(D, num_heads)
    G = D // lanes
    kern = functools.partial(_attn_kernel, heads_per_group=lanes // hd,
                             head_dim=hd)
    return pl.pallas_call(
        kern,
        out_shape=jax.ShapeDtypeStruct((B, S, D), out_dtype),
        grid=(B, G),
        in_specs=[pl.BlockSpec((1, S, 3 * lanes), lambda b, g: (b, 0, g))],
        out_specs=pl.BlockSpec((1, S, lanes), lambda b, g: (b, 0, g)),
        compiler_params=pltpu.CompilerParams(
            dimension_semantics=("parallel", "parallel")),
    )(qkv_grouped)


# ------------------------------ layernorm kernel ----------------------------

def _layernorm_kernel(x_ref, g_ref, b_ref, o_ref, *, eps):
    x = x_ref[...].astype(jnp.float32)
    mu = jnp.mean(x, axis=-1, keepdims=True)
    xc = x - mu
    var = jnp.mean(xc * xc, axis=-1, keepdims=True)
    inv = jax.lax.rsqrt(var + eps)
    o_ref[...] = (xc * inv * g_ref[...] + b_ref[...]).astype(o_ref.dtype)


def pallas_layernorm(x, gamma, beta, eps=1e-6, out_dtype=jnp.float32):
    M, D = x.shape
    tm = min(256, _round_up(M, 8))
    return pl.pallas_call(
        functools.partial(_layernorm_kernel, eps=eps),
        out_shape=jax.ShapeDtypeStruct((M, D), out_dtype),
        grid=(pl.cdiv(M, tm),),
        in_specs=[pl.BlockSpec((tm, D), lambda i: (i, 0)),
                  pl.BlockSpec((1, D), lambda i: (0, 0)),
                  pl.BlockSpec((1, D), lambda i: (0, 0))],
        out_specs=pl.BlockSpec((tm, D), lambda i: (i, 0)),
        compiler_params=pltpu.CompilerParams(dimension_semantics=("parallel",)),
    )(x, gamma.reshape(1, D), beta.reshape(1, D))


# ---------------------- batched BatchNorm1d (single step) -------------------

def _bn_kernel(x_ref, g_ref, b_ref, m_ref, v_ref, o_ref, *, eps):
    inv = jax.lax.rsqrt(v_ref[...] + eps)
    o_ref[...] = (x_ref[...] - m_ref[...]) * inv * g_ref[...] + b_ref[...]


def pallas_batchnorm1d_batched(x, gamma, beta, mean, var, eps=1e-5):
    """Inference BatchNorm1d for G independent branches in one grid step.
    x: (G, B, D); gamma/beta/mean/var: (G, D)."""
    G, B, D = x.shape
    vec = pl.BlockSpec((G, 1, D), lambda i: (0, 0, 0))
    full = pl.BlockSpec((G, B, D), lambda i: (0, 0, 0))
    return pl.pallas_call(
        functools.partial(_bn_kernel, eps=eps),
        out_shape=jax.ShapeDtypeStruct((G, B, D), jnp.float32),
        grid=(1,),
        in_specs=[full, vec, vec, vec, vec],
        out_specs=full,
    )(x, gamma.reshape(G, 1, D), beta.reshape(G, 1, D),
      mean.reshape(G, 1, D), var.reshape(G, 1, D))


# -------------------------------- model pieces ------------------------------

def transformer_block(x, p, num_heads):
    """Pre-norm ViT block; LN / bias / GELU / residual fused into the matmuls.
    bf16 intermediates, f32 residual stream."""
    B, S, D = x.shape
    x2 = x.reshape(B * S, D)                                      # f32 stream
    qkv = fused_linear(x2, p["qkv_w"], p["qkv_b"],
                       ln=(p["ln1_g"], p["ln1_b"]),
                       out_dtype=jnp.bfloat16)                    # LN1 + qkv
    attn = pallas_attention(qkv.reshape(B, S, 3 * D), D, num_heads)
    x2 = fused_linear(attn.reshape(B * S, D), p["proj_w"], p["proj_b"],
                      residual=x2, out_dtype=jnp.float32)         # proj + add
    h = fused_linear(x2, p["fc1_w"], p["fc1_b"],
                     ln=(p["ln2_g"], p["ln2_b"]), activation="gelu",
                     out_dtype=jnp.bfloat16)                      # LN2+fc1+GELU
    x2 = fused_linear(h, p["fc2_w"], p["fc2_b"], residual=x2,
                      out_dtype=jnp.float32)                      # fc2 + add
    return x2.reshape(B, S, D)


def image_to_patches(x, p):
    """NCHW -> (B, num_patches, C*p*p), matching Conv2d(kernel=stride=p).
    TODO(synk): overlapping patch embed (stride < patch) is not expressible
    with this reshape path."""
    B, C, H, W = x.shape
    x = x.reshape(B, C, H // p, p, W // p, p)
    x = x.transpose(0, 2, 4, 1, 3, 5)
    return x.reshape(B, (H // p) * (W // p), C * p * p)


def vit_base_forward(x_img, params, num_heads):
    """ViT backbone with local_feature=True: runs blocks[:-1], no final norm."""
    p = params["patch_size"]
    patches = image_to_patches(x_img, p)
    B, Npch, Kp = patches.shape
    D = params["patch_w"].shape[1]
    tok = fused_linear(patches.reshape(B * Npch, Kp),
                       params["patch_w"], params["patch_b"],
                       out_dtype=jnp.float32).reshape(B, Npch, D)
    cls = jnp.broadcast_to(params["cls_token"], (B, 1, D))
    x = jnp.concatenate([cls, tok], axis=1) + params["pos_embed"]
    for blk in params["blocks"][:-1]:
        x = transformer_block(x, blk, num_heads)
    return x


def shuffle_unit(features, shift, group, begin=1):
    B = features.shape[0]
    dim = features.shape[-1]
    x = jnp.concatenate([features[:, begin - 1 + shift:],
                         features[:, begin:begin - 1 + shift]], axis=1)
    # token count divisible by `group`, so PyTorch's except-branch never fires
    x = x.reshape(B, group, -1, dim)
    x = jnp.transpose(x, (0, 2, 1, 3))
    return x.reshape(B, -1, dim)


def build_transformer_local_forward(x_img, params, *, num_heads, divide_length,
                                    shift_num, shuffle_groups, rearrange,
                                    neck_feat):
    features = vit_base_forward(x_img, params, num_heads)          # (B, S, D)
    B, S, D = features.shape
    last_blk = params["blocks"][-1]   # b1 and b2 are deepcopies of this + norm

    # b1 branch: [last block, norm] over the full sequence, keep CLS only.
    b1_cls = transformer_block(features, last_blk, num_heads)[:, 0]   # (B, D)

    feature_length = S - 1
    patch_length = feature_length // divide_length
    token = features[:, 0:1]
    if rearrange:
        xsh = shuffle_unit(features, shift_num, shuffle_groups)
    else:
        xsh = features[:, 1:]

    # Batch the 4 local b2 branches into one call -> the last block's weights
    # stream from HBM once instead of 4 times.
    chunks = [jnp.concatenate(
        [token, xsh[:, kk * patch_length:(kk + 1) * patch_length]], axis=1)
        for kk in range(4)]
    stacked = jnp.concatenate(chunks, axis=0)                      # (4B, L, D)
    b2_cls = transformer_block(stacked, last_blk, num_heads)[:, 0]  # (4B, D)

    # One LayerNorm call for all 5 CLS rows (LN is rowwise, so slicing the CLS
    # token before the norm equals norm-then-slice).
    cls_all = pallas_layernorm(jnp.concatenate([b1_cls, b2_cls], axis=0),
                               params["norm_g"], params["norm_b"])   # (5B, D)
    global_feat = cls_all[:B]
    local_cls = cls_all[B:].reshape(4, B, D)

    if neck_feat == "after":
        # 5 BatchNorm1d bottlenecks in one grid step; /4 folded into gamma/beta.
        feats = jnp.concatenate([global_feat[None], local_cls], axis=0)  # (5,B,D)
        scale = jnp.array([1.0, 0.25, 0.25, 0.25, 0.25],
                          jnp.float32).reshape(5, 1)
        bn_g = jnp.stack([params["bn"][i][0] for i in range(5)]) * scale
        bn_b = jnp.stack([params["bn"][i][1] for i in range(5)]) * scale
        bn_m = jnp.stack([params["bn"][i][2] for i in range(5)])
        bn_v = jnp.stack([params["bn"][i][3] for i in range(5)])
        bn_out = pallas_batchnorm1d_batched(feats, bn_g, bn_b, bn_m, bn_v)
        parts = [bn_out[i] for i in range(5)]
    else:
        parts = [global_feat] + [local_cls[i] / 4.0 for i in range(4)]
    return jnp.concatenate(parts, axis=1)


# --------------------------- deterministic params ---------------------------

def init_params(key, *, C, p, D, depth, mlp_hidden, num_patches, num_heads):
    keys = jax.random.split(key, 64)
    ki = iter(keys)

    def nrm(shape, scale=0.02):
        return scale * jax.random.normal(next(ki), shape, dtype=jnp.float32)

    def w_bf16(shape):
        return nrm(shape).astype(jnp.bfloat16)     # matmul weights live in bf16

    params = {
        "patch_size": p,
        "patch_w": w_bf16((C * p * p, D)),          # flattened Conv2d weight
        "patch_b": jnp.zeros((D,), jnp.float32),
        "cls_token": nrm((1, 1, D)),
        "pos_embed": nrm((1, num_patches + 1, D)),
        "norm_g": jnp.ones((D,), jnp.float32),
        "norm_b": jnp.zeros((D,), jnp.float32),
    }
    blocks = []
    for _ in range(depth):
        qkv_w = nrm((D, 3 * D))
        qkv_b = jnp.zeros((3 * D,), jnp.float32)
        # fold attention scale into q columns + permute to head-group layout
        qkv_w, qkv_b = prep_qkv_params(qkv_w, qkv_b, D, num_heads)
        blocks.append({
            "ln1_g": jnp.ones((D,), jnp.float32), "ln1_b": jnp.zeros((D,), jnp.float32),
            "qkv_w": qkv_w, "qkv_b": qkv_b,
            "proj_w": w_bf16((D, D)), "proj_b": jnp.zeros((D,), jnp.float32),
            "ln2_g": jnp.ones((D,), jnp.float32), "ln2_b": jnp.zeros((D,), jnp.float32),
            "fc1_w": w_bf16((D, mlp_hidden)), "fc1_b": jnp.zeros((mlp_hidden,), jnp.float32),
            "fc2_w": w_bf16((mlp_hidden, D)), "fc2_b": jnp.zeros((D,), jnp.float32),
        })
    params["blocks"] = blocks

    bns = []
    for _ in range(5):  # bottleneck, bottleneck_1..4
        gamma = jnp.ones((D,), jnp.float32)    # weights_init_kaiming: BN weight = 1
        beta = jnp.zeros((D,), jnp.float32)    # BN bias = 0 (and frozen)
        mean = 0.1 * jax.random.normal(next(ki), (D,), dtype=jnp.float32)
        var = 0.5 + jax.random.uniform(next(ki), (D,), dtype=jnp.float32)
        bns.append((gamma, beta, mean, var))
    params["bn"] = bns
    return params


# ----------------------------------- main -----------------------------------

if __name__ == "__main__":
    B, C, H, W = 2, 4, 16, 16      # small synthetic image, NCHW
    PATCH = 4
    D = 32                         # embedding dim (stands in for 768)
    NUM_HEADS = 4
    MLP = 4 * D
    DEPTH = 2                      # base runs blocks[:-1]; last block feeds b1/b2
    NP = (H // PATCH) * (W // PATCH)   # 16 patches -> seq = 17

    key = jax.random.PRNGKey(0)
    kx, kp = jax.random.split(key)
    x = jax.random.normal(kx, (B, C, H, W), dtype=jnp.float32)
    params = init_params(kp, C=C, p=PATCH, D=D, depth=DEPTH,
                         mlp_hidden=MLP, num_patches=NP, num_heads=NUM_HEADS)

    out = build_transformer_local_forward(
        x, params,
        num_heads=NUM_HEADS,
        divide_length=4,        # cfg.MODEL.DEVIDE_LENGTH
        shift_num=5,            # cfg.MODEL.SHIFT_NUM
        shuffle_groups=2,       # cfg.MODEL.SHUFFLE_GROUP
        rearrange=True,         # cfg.MODEL.RE_ARRANGE
        neck_feat="after",      # cfg.TEST.NECK_FEAT
    )
    out = jax.block_until_ready(out)
    assert out.shape == (B, 5 * D), out.shape
    assert bool(jnp.all(jnp.isfinite(out)))
    print("KERNEL_OK")
</pallas_src>

<mosaic_0001>
module attributes {stable_mosaic.version = 11 : i64} {
  func.func @_fused_linear_kernel(%arg0: i32, %arg1: memref<32x64xf32, #tpu.memory_space<vmem>>, %arg2: memref<64x32xbf16, #tpu.memory_space<vmem>>, %arg3: memref<1x32xf32, #tpu.memory_space<vmem>>, %arg4: memref<32x32xf32, #tpu.memory_space<vmem>>) attributes {dimension_semantics = [#tpu.dimension_semantics<parallel>], iteration_bounds = array<i64: 1>, scalar_prefetch = 0 : i64, scratch_operands = 0 : i64, tpu.core_type = #tpu.core_type<tc>, window_params = [{transform_indices = @transform_0, window_bounds = array<i64: 32, 64>}, {pipeline_mode = #tpu.pipeline_mode<synchronous>, transform_indices = @transform_1, window_bounds = array<i64: 64, 32>}, {pipeline_mode = #tpu.pipeline_mode<synchronous>, transform_indices = @transform_2, window_bounds = array<i64: 1, 32>}, {transform_indices = @transform_3, window_bounds = array<i64: 32, 32>}]} {
    %c0 = arith.constant 0 : index
    %c0_0 = arith.constant 0 : index
    %0 = vector.load %arg1[%c0, %c0_0] : memref<32x64xf32, #tpu.memory_space<vmem>>, vector<32x64xf32>
    %1 = arith.truncf %0 : vector<32x64xf32> to vector<32x64xbf16>
    %c0_1 = arith.constant 0 : index
    %c0_2 = arith.constant 0 : index
    %2 = vector.load %arg2[%c0_1, %c0_2] : memref<64x32xbf16, #tpu.memory_space<vmem>>, vector<64x32xbf16>
    %cst = arith.constant dense<0.000000e+00> : vector<32x32xf32>
    %3 = tpu.matmul %1, %2, %cst {dimension_numbers = #tpu.dot_dimension_numbers<[1], [0], [0], [1], [0, 0, 1, 1], [], []>} : vector<32x64xbf16>, vector<64x32xbf16>, vector<32x32xf32> -> vector<32x32xf32>
    %c0_3 = arith.constant 0 : index
    %c0_4 = arith.constant 0 : index
    %4 = vector.load %arg3[%c0_3, %c0_4] : memref<1x32xf32, #tpu.memory_space<vmem>>, vector<1x32xf32>
    %5 = vector.broadcast %4 : vector<1x32xf32> to vector<32x32xf32>
    %6 = arith.addf %3, %5 : vector<32x32xf32>
    %c0_5 = arith.constant 0 : index
    %c0_6 = arith.constant 0 : index
    %7 = vector.load %arg4[%c0_5, %c0_6] : memref<32x32xf32, #tpu.memory_space<vmem>>, vector<32x32xf32>
    tpu.vector_store %arg4[%c0_5, %c0_6], %6 {strides = array<i32>} : memref<32x32xf32, #tpu.memory_space<vmem>>, vector<32x32xf32>,
    return
  }
  func.func @transform_0(%arg0: i32) -> (i32, i32) {
    %c0_i32 = arith.constant 0 : i32
    %c0_i32_0 = arith.constant 0 : i32
    return %arg0, %c0_i32 : i32, i32
  }
  func.func @transform_1(%arg0: i32) -> (i32, i32) {
    %c0_i32 = arith.constant 0 : i32
    %c0_i32_0 = arith.constant 0 : i32
    %c0_i32_1 = arith.constant 0 : i32
    return %c0_i32, %c0_i32_0 : i32, i32
  }
  func.func @transform_2(%arg0: i32) -> (i32, i32) {
    %c0_i32 = arith.constant 0 : i32
    %c0_i32_0 = arith.constant 0 : i32
    %c0_i32_1 = arith.constant 0 : i32
    return %c0_i32, %c0_i32_0 : i32, i32
  }
  func.func @transform_3(%arg0: i32) -> (i32, i32) {
    %c0_i32 = arith.constant 0 : i32
    %c0_i32_0 = arith.constant 0 : i32
    return %arg0, %c0_i32 : i32, i32
  }
}

</mosaic_0001>

<bundles_post_ra>
// kernel: tpu_custom_call.1
= control target key start
LH: loop header
LB: loop body
LE: loop exit
PB: predicated region body
PF: predicated region fallthrough
CT: control target
= control target key end

     0   :  { %s220_s0 = inlined_call_operand.vmem [shape: f32[32,64], index: 0, kind: input, shape index: {}]   ;;  %s221_s1 = inlined_call_operand.vmem [shape: bf16[64,32], index: 1, kind: input, shape index: {}]   ;;  %s222_s2 = inlined_call_operand.vmem [shape: f32[1,32], index: 2, kind: input, shape index: {}]   ;;  %s223_s3 = inlined_call_operand.hbm [shape: f32[32,32], index: 3, kind: output, shape index: {}]  }
   0x1   :  { %v128_v0 = vld [vmem:[%s221_s1 + $0x18] sm:$0xff]  ;;  %v127_v1 = vld [vmem:[%s221_s1 + $0x10] sm:$0xff] }
   0x2   :  { %69 = vmatpush.bf16.msra.mxu0 %v128_v0  ;;  %129 = vmatpush.bf16.msra.mxu1 %v128_v0 }
   0x3   :  { %8 = vsyncpa [#allocation3], 0  ;;  %v126_v2 = vld [vmem:[%s221_s1 + $0x8] sm:$0xff]  ;;  %v125_v3 = vld [vmem:[%s221_s1] sm:$0xff]  ;;  %vm58_vm0 = vcmask 523264   ;;  %vm84_vm1 = vcmask 261120  }
   0x4   :  { %v16_v4 = vld [vmem:[%s220_s0] sm:$0xff]  ;;  %v17_v5 = vld [vmem:[%s220_s0 + $0x8] sm:$0xff]  ;;  %v18_v6 = vld [vmem:[%s220_s0 + $0x10] sm:$0xff]  ;;  %s95_s5 = sshll.u32 %s223_s3, 4  ;;  %s165_s6 = smov 8   ;;  %s96_s5 = int_to_ptr.hbm [resolvable:$true] %s95_s5 }
   0x5   :  { %v19_v7 = vld [vmem:[%s220_s0 + $0x18] sm:$0xff]  ;;  %v20_v8 = vpack.c.bf16 %v17_v5, %v16_v4  ;;  %v136_v10 = vld [vmem:[%s222_s2] ss:$0 sm:$0xff]  ;;  %s163_s0 = smov [#allocation2]   ;;  %s164_s2 = smov 128  }
   0x6   :  { %70 = vmatpush.bf16.msra.mxu0 %v127_v1  ;;  %130 = vmatpush.bf16.msra.mxu1 %v127_v1  ;;  %v21_v9 = vpack.c.bf16 %v19_v7, %v18_v6  ;;  %s93_s29 = sshll.u32 %s163_s0, 4  ;;  %s94_s29 = int_to_ptr.vmem [resolvable:$true] %s93_s29 }
   0xa   :  { %71 = vmatpush.bf16.msra.mxu0 %v126_v2  ;;  %131 = vmatpush.bf16.msra.mxu1 %v126_v2 }
   0xe   :  { %72 = vmatpush.bf16.msra.mxu0 %v125_v3  ;;  %132 = vmatpush.bf16.msra.mxu1 %v125_v3 }
  0x11   :  { %123 = vmatmul.msk.bf16.vlgmr.msra.gmra.mxu0 %vm58_vm0, %v20_v8  ;;  %124 = vmatmul.msk.bf16.vlgmr.msra.gmra.mxu1 %vm58_vm0, %v21_v9 }
  0x8e   :  { %v74_v11 = vpop.f32.mrf.mxu0  ;;  %v79_v12 = vpop.f32.mrf.mxu1 }
  0x8f   :  { %v75_v13 = vadd.f32 %v136_v10, %v74_v11  ;;  %v80_v14 = vadd.f32 %v136_v10, %v79_v12 }
  0x91   :  { %85 = vst.msk [vmem:[#allocation2] sm:$0xff] %vm84_vm1, %v75_v13 }
  0x92   :  { %87 = vst.msk [vmem:[#allocation2 + $0x10] sm:$0xff] %vm84_vm1, %v80_v14 }
  0x96   :  { %v76_v15 = vpop.f32.mrf.mxu0  ;;  %v81_v16 = vpop.f32.mrf.mxu1 }
  0x97   :  { %v77_v17 = vadd.f32 %v136_v10, %v76_v15  ;;  %v82_v18 = vadd.f32 %v136_v10, %v81_v16 }
  0x99   :  { %86 = vst.msk [vmem:[#allocation2 + $0x8] sm:$0xff] %vm84_vm1, %v77_v17 }
  0x9a   :  { %88 = vst.msk [vmem:[#allocation2 + $0x18] sm:$0xff] %vm84_vm1, %v82_v18 }
  0x9b   :  { %101 = dma.vmem_to_hbm [thread:$0]  %s94_s29, 512, %s96_s5, [#allocation3], %s164_s2, %s164_s2, %s165_s6  }
  0x9c   :  { %161 = dma.done.wait [#allocation3], 512  }
  0x9d   :  { %162 = vsyncadd [#allocation3], 4294966784 }
  0x9e   :  { %106 = vsyncpa [#allocation3], 1 }

</bundles_post_ra>
